<compile_context>
chip_gen: v7x
topology: tpu7x:2x2x1
jax: 0.10.0
libtpu: 0.0.40
codegen_flags: <defaults>
</compile_context>

<pallas_src>
import jax
import jax.numpy as jnp
from jax.experimental import pallas as pl
from jax.experimental.pallas import tpu as pltpu


def _round_up(x: int, m: int) -> int:
    return ((x + m - 1) // m) * m


def relation_network_kernel(x_ref, w1_ref, b1_ref, w2_ref, b2_ref, o_ref):
    # fc1 + ReLU (f32 accumulation on the MXU)
    h = jnp.dot(x_ref[...], w1_ref[...], preferred_element_type=jnp.float32)
    h = jnp.maximum(h + b1_ref[...], 0.0)          # b1 is [1, hidden] -> broadcasts
    # fc2 + sigmoid (sigmoid -> exp on the EUP, free slot on a DMA-bound kernel)
    y = jnp.dot(h, w2_ref[...], preferred_element_type=jnp.float32)
    o_ref[...] = jax.nn.sigmoid(y + b2_ref[...]).astype(o_ref.dtype)


def relation_network(x, w1, b1, w2, b2, *, batch_tile=8192):
    """x: [B, input_size]; w1: [input_size, hidden]; b1: [hidden];
    w2: [hidden, output]; b2: [output]  ->  [B, output]"""
    B, in_sz = x.shape
    hidden = w1.shape[1]
    out_sz = w2.shape[1]

    # Batch tile: multiple of 8 (sublane), large enough to amortize the ~0.35 us
    # per-step overhead, small enough that double-buffered x/out tiles plus the
    # resident weights stay far inside the 32 MiB scoped VMEM budget (v7x has
    # only 64 MiB physical).
    TB = min(batch_tile, _round_up(B, 8))
    # v7x has 2 TensorCores: when the batch is big enough, cap TB so the grid has
    # >= 2 steps and the "parallel" axis can actually shard across cores.
    if B >= 16:
        TB = min(TB, _round_up(pl.cdiv(B, 2), 8))

    f32 = jnp.float32
    w1 = w1.astype(f32)
    w2 = w2.astype(f32)
    b1_2d = b1.astype(f32).reshape(1, hidden)   # 2-D for clean TPU layout/broadcast
    b2_2d = b2.astype(f32).reshape(1, out_sz)

    # Honest (unpadded) scheduling hint for XLA around the custom call.
    cost = pl.CostEstimate(
        flops=2 * B * (in_sz * hidden + hidden * out_sz),
        transcendentals=B * out_sz,              # sigmoid -> exp on the EUP
        bytes_accessed=(
            B * in_sz * x.dtype.itemsize         # x read
            + B * out_sz * x.dtype.itemsize      # out write
            + (in_sz * hidden + hidden * out_sz + hidden + out_sz) * 4
        ),
    )

    grid = (pl.cdiv(B, TB),)
    return pl.pallas_call(
        relation_network_kernel,
        out_shape=jax.ShapeDtypeStruct((B, out_sz), x.dtype),
        grid_spec=pl.GridSpec(
            grid=grid,
            in_specs=[
                pl.BlockSpec((TB, in_sz), lambda i: (i, 0)),      # x: tiled over batch
                pl.BlockSpec((in_sz, hidden), lambda i: (0, 0)),  # weights stay resident
                pl.BlockSpec((1, hidden), lambda i: (0, 0)),
                pl.BlockSpec((hidden, out_sz), lambda i: (0, 0)),
                pl.BlockSpec((1, out_sz), lambda i: (0, 0)),
            ],
            out_specs=pl.BlockSpec((TB, out_sz), lambda i: (i, 0)),
        ),
        compiler_params=pltpu.CompilerParams(
            dimension_semantics=("parallel",),     # shard batch tiles across TCs (v7x)
            vmem_limit_bytes=32 * 1024 * 1024,     # explicit (v5e scoped default is 16 MiB)
        ),
        cost_estimate=cost,
    )(x, w1, b1_2d, w2, b2_2d)
    # TODO(synk): optional bf16 HBM legs (x/weights/output) would halve DMA traffic
    # further but requires relaxing the 1e-5 parity tolerance; kept f32 here.


if __name__ == "__main__":
    # Small shapes consistent with the module: input_size=64, hidden_size=32, output_size=16
    batch = 8
    input_size, hidden_size, output_size = 64, 32, 16

    key = jax.random.PRNGKey(0)
    kx, kw1, kb1, kw2, kb2 = jax.random.split(key, 5)

    x = jax.random.normal(kx, (batch, input_size), dtype=jnp.float32)
    # Deterministic parameter init (synthetic; mimics nn.Linear's uniform fan-in scaling)
    lim1 = 1.0 / (input_size ** 0.5)
    lim2 = 1.0 / (hidden_size ** 0.5)
    w1 = jax.random.uniform(kw1, (input_size, hidden_size), jnp.float32, -lim1, lim1)
    b1 = jax.random.uniform(kb1, (hidden_size,), jnp.float32, -lim1, lim1)
    w2 = jax.random.uniform(kw2, (hidden_size, output_size), jnp.float32, -lim2, lim2)
    b2 = jax.random.uniform(kb2, (output_size,), jnp.float32, -lim2, lim2)

    out = relation_network(x, w1, b1, w2, b2)
    out = jax.block_until_ready(out)

    # Cross-check against plain JAX reference
    ref = jax.nn.sigmoid(jnp.maximum(x @ w1 + b1, 0.0) @ w2 + b2)
    assert out.shape == (batch, output_size)
    assert jnp.allclose(out, ref, atol=1e-5, rtol=1e-5)

    print("KERNEL_OK")
</pallas_src>

<mosaic_0001>
module attributes {stable_mosaic.version = 11 : i64} {
  func.func @relation_network_kernel(%arg0: i32, %arg1: memref<8x64xf32, #tpu.memory_space<vmem>>, %arg2: memref<64x32xf32, #tpu.memory_space<vmem>>, %arg3: memref<1x32xf32, #tpu.memory_space<vmem>>, %arg4: memref<32x16xf32, #tpu.memory_space<vmem>>, %arg5: memref<1x16xf32, #tpu.memory_space<vmem>>, %arg6: memref<8x16xf32, #tpu.memory_space<vmem>>) attributes {dimension_semantics = [#tpu.dimension_semantics<parallel>], iteration_bounds = array<i64: 1>, scalar_prefetch = 0 : i64, scratch_operands = 0 : i64, tpu.core_type = #tpu.core_type<tc>, window_params = [{transform_indices = @transform_0, window_bounds = array<i64: 8, 64>}, {pipeline_mode = #tpu.pipeline_mode<synchronous>, transform_indices = @transform_1, window_bounds = array<i64: 64, 32>}, {pipeline_mode = #tpu.pipeline_mode<synchronous>, transform_indices = @transform_2, window_bounds = array<i64: 1, 32>}, {pipeline_mode = #tpu.pipeline_mode<synchronous>, transform_indices = @transform_3, window_bounds = array<i64: 32, 16>}, {pipeline_mode = #tpu.pipeline_mode<synchronous>, transform_indices = @transform_4, window_bounds = array<i64: 1, 16>}, {transform_indices = @transform_5, window_bounds = array<i64: 8, 16>}]} {
    %c0 = arith.constant 0 : index
    %c0_0 = arith.constant 0 : index
    %0 = vector.load %arg1[%c0, %c0_0] : memref<8x64xf32, #tpu.memory_space<vmem>>, vector<8x64xf32>
    %c0_1 = arith.constant 0 : index
    %c0_2 = arith.constant 0 : index
    %1 = vector.load %arg2[%c0_1, %c0_2] : memref<64x32xf32, #tpu.memory_space<vmem>>, vector<64x32xf32>
    %cst = arith.constant dense<0.000000e+00> : vector<8x32xf32>
    %2 = tpu.matmul %0, %1, %cst {dimension_numbers = #tpu.dot_dimension_numbers<[1], [0], [0], [1], [0, 0, 1, 1], [], []>} : vector<8x64xf32>, vector<64x32xf32>, vector<8x32xf32> -> vector<8x32xf32>
    %c0_3 = arith.constant 0 : index
    %c0_4 = arith.constant 0 : index
    %3 = vector.load %arg3[%c0_3, %c0_4] : memref<1x32xf32, #tpu.memory_space<vmem>>, vector<1x32xf32>
    %4 = vector.broadcast %3 : vector<1x32xf32> to vector<8x32xf32>
    %5 = arith.addf %2, %4 : vector<8x32xf32>
    %cst_5 = arith.constant 0.000000e+00 : f32
    %6 = vector.broadcast %cst_5 : f32 to vector<8x32xf32>
    %7 = arith.maximumf %5, %6 : vector<8x32xf32>
    %c0_6 = arith.constant 0 : index
    %c0_7 = arith.constant 0 : index
    %8 = vector.load %arg4[%c0_6, %c0_7] : memref<32x16xf32, #tpu.memory_space<vmem>>, vector<32x16xf32>
    %cst_8 = arith.constant dense<0.000000e+00> : vector<8x16xf32>
    %9 = tpu.matmul %7, %8, %cst_8 {dimension_numbers = #tpu.dot_dimension_numbers<[1], [0], [0], [1], [0, 0, 1, 1], [], []>} : vector<8x32xf32>, vector<32x16xf32>, vector<8x16xf32> -> vector<8x16xf32>
    %c0_9 = arith.constant 0 : index
    %c0_10 = arith.constant 0 : index
    %10 = vector.load %arg5[%c0_9, %c0_10] : memref<1x16xf32, #tpu.memory_space<vmem>>, vector<1x16xf32>
    %11 = vector.broadcast %10 : vector<1x16xf32> to vector<8x16xf32>
    %12 = arith.addf %9, %11 : vector<8x16xf32>
    %13 = arith.negf %12 : vector<8x16xf32>
    %14 = math.exp %13 : vector<8x16xf32>
    %cst_11 = arith.constant 1.000000e+00 : f32
    %15 = vector.broadcast %cst_11 : f32 to vector<8x16xf32>
    %16 = arith.addf %15, %14 : vector<8x16xf32>
    %17 = arith.divf %15, %16 : vector<8x16xf32>
    %c0_12 = arith.constant 0 : index
    %c0_13 = arith.constant 0 : index
    %18 = vector.load %arg6[%c0_12, %c0_13] : memref<8x16xf32, #tpu.memory_space<vmem>>, vector<8x16xf32>
    tpu.vector_store %arg6[%c0_12, %c0_13], %17 {strides = array<i32>} : memref<8x16xf32, #tpu.memory_space<vmem>>, vector<8x16xf32>,
    return
  }
  func.func @transform_0(%arg0: i32) -> (i32, i32) {
    %c0_i32 = arith.constant 0 : i32
    %c0_i32_0 = arith.constant 0 : i32
    return %arg0, %c0_i32 : i32, i32
  }
  func.func @transform_1(%arg0: i32) -> (i32, i32) {
    %c0_i32 = arith.constant 0 : i32
    %c0_i32_0 = arith.constant 0 : i32
    %c0_i32_1 = arith.constant 0 : i32
    return %c0_i32, %c0_i32_0 : i32, i32
  }
  func.func @transform_2(%arg0: i32) -> (i32, i32) {
    %c0_i32 = arith.constant 0 : i32
    %c0_i32_0 = arith.constant 0 : i32
    %c0_i32_1 = arith.constant 0 : i32
    return %c0_i32, %c0_i32_0 : i32, i32
  }
  func.func @transform_3(%arg0: i32) -> (i32, i32) {
    %c0_i32 = arith.constant 0 : i32
    %c0_i32_0 = arith.constant 0 : i32
    %c0_i32_1 = arith.constant 0 : i32
    return %c0_i32, %c0_i32_0 : i32, i32
  }
  func.func @transform_4(%arg0: i32) -> (i32, i32) {
    %c0_i32 = arith.constant 0 : i32
    %c0_i32_0 = arith.constant 0 : i32
    %c0_i32_1 = arith.constant 0 : i32
    return %c0_i32, %c0_i32_0 : i32, i32
  }
  func.func @transform_5(%arg0: i32) -> (i32, i32) {
    %c0_i32 = arith.constant 0 : i32
    %c0_i32_0 = arith.constant 0 : i32
    return %arg0, %c0_i32 : i32, i32
  }
}

</mosaic_0001>

<bundles_post_ra>
// kernel: tpu_custom_call.1
= control target key start
LH: loop header
LB: loop body
LE: loop exit
PB: predicated region body
PF: predicated region fallthrough
CT: control target
= control target key end

     0   :  { %v318_v3 = vmov 0.0|0.0   ;;  %vm319_vm0 = vmmov 0   ;;  %v320_v6 = vmov 0.0   ;;  %s409_s0 = inlined_call_operand.vmem [shape: f32[8,64], index: 0, kind: input, shape index: {}]   ;;  %s410_s1 = inlined_call_operand.vmem [shape: f32[64,32], index: 1, kind: input, shape index: {}]   ;;  %s411_s2 = inlined_call_operand.vmem [shape: f32[1,32], index: 2, kind: input, shape index: {}]   ;;  %s412_s3 = inlined_call_operand.vmem [shape: f32[32,16], index: 3, kind: input, shape index: {}]   ;;  %s413_s4 = inlined_call_operand.vmem [shape: f32[1,16], index: 4, kind: input, shape index: {}]   ;;  %s414_s5 = inlined_call_operand.hbm [shape: f32[8,16], index: 5, kind: output, shape index: {}]  }
   0x1   :  { %v22_v0 = vld [vmem:[%s410_s1] sm:$0xff]  ;;  %v23_v1 = vld [vmem:[%s410_s1 + $0x8] sm:$0xff]  ;;  %v24_v2 = vld [vmem:[%s410_s1 + $0x10] sm:$0xff]  ;;  %268 = vmatprep.subr.bf16.mxu0 %v318_v3  ;;  %254 = vmatprep.mubr.msk.f32.mxu0 %vm319_vm0, %v320_v6 }
   0x2   :  { %v269_v4 = vpack.c.bf16 %v23_v1, %v22_v0  ;;  %v25_v5 = vld [vmem:[%s410_s1 + $0x18] sm:$0xff]  ;;  %280 = vmatprep.subr.bf16.mxu1 %v318_v3  ;;  %265 = vmatprep.mubr.msk.f32.mxu1 %vm319_vm0, %v320_v6  ;;  %v112_v8 = vld [vmem:[%s412_s3] sm:$0xff]  ;;  %v113_v9 = vld [vmem:[%s412_s3 + $0x8] sm:$0xff] }
   0x3   :  { %v272_v7 = vpack.c.bf16 %v25_v5, %v24_v2  ;;  %v26_v10 = vld [vmem:[%s410_s1 + $0x20] sm:$0xff]  ;;  %v27_v11 = vld [vmem:[%s410_s1 + $0x28] sm:$0xff]  ;;  %v281_v12 = vpack.c.bf16 %v113_v9, %v112_v8 }
   0x4   :  { %270 = vmatpush3.bf16.msra.mxu0 %v269_v4 }
   0x5   :  { %271 = vmatprep.subr.bf16.mxu0 %v318_v3 }
   0x6   :  { %10 = vsyncpa [#allocation3], 0  ;;  %282 = vmatpush3.bf16.msra.mxu1 %v281_v12  ;;  %v275_v13 = vpack.c.bf16 %v27_v11, %v26_v10  ;;  %v28_v14 = vld [vmem:[%s410_s1 + $0x30] sm:$0xff]  ;;  %v29_v15 = vld [vmem:[%s410_s1 + $0x38] sm:$0xff]  ;;  %vm37_vm1 = vcmask 523264   ;;  %vm123_vm2 = vcmask 261120  }
   0x7   :  { %283 = vmatprep.subr.bf16.mxu1 %v318_v3  ;;  %v278_v16 = vpack.c.bf16 %v29_v15, %v28_v14  ;;  %v21_v17 = vld [vmem:[%s409_s0] sm:$0xff]  ;;  %v114_v18 = vld [vmem:[%s412_s3 + $0x10] sm:$0xff]  ;;  %v115_v19 = vld [vmem:[%s412_s3 + $0x18] sm:$0xff]  ;;  %s321_s3 = smov [#allocation2]   ;;  %vm203_vm3 = vcmask 130048  }
   0x8   :  { %273 = vmatpush3.bf16.msra.mxu0 %v272_v7  ;;  %v284_v20 = vpack.c.bf16 %v115_v19, %v114_v18  ;;  %v219_v21 = vld [vmem:[%s411_s2] ss:$0 sm:$0xff]  ;;  %s211_s2 = sshll.u32 %s321_s3, 4  ;;  %s212_s2 = int_to_ptr.vmem [resolvable:$true] %s211_s2 }
   0x9   :  { %274 = vmatprep.subr.bf16.mxu0 %v318_v3  ;;  %v221_v26 = vld [vmem:[%s413_s4] ss:$0 sm:$0xff]  ;;  %s294_s21 = scalar_lea.vmem %s212_s2, 128  ;;  %p299_p1 = scmp.lt.s32.totalorder %s212_s2, %s212_s2 }
   0xa   :  { %285 = vmatpush3.bf16.msra.mxu1 %v284_v20  ;;  %p295_p0 = scmp.ne.s32.totalorder %s212_s2, %s294_s21  ;;  %p300_p2 = scmp.lt.s32.totalorder %s294_s21, %s294_s21 }
   0xc   :  { %276 = vmatpush3.bf16.msra.mxu0 %v275_v13  ;;  %p301_p3 = por %p300_p2, %p299_p1 }
   0xd   :  { %277 = vmatprep.subr.bf16.mxu0 %v318_v3 }
   0xe   :  { %p302_p4 = pnand %p301_p3, %p295_p0 }
  0x10   :  { %279 = vmatpush3.bf16.msra.mxu0 %v278_v16 }
  0x13   :  { %255 = vmatmul.mubr.msk.f32.vlgmr.msra.gmra.mrb[0].mxu0 %vm37_vm1, %v21_v17 }
  0xe6   :  { %v107_v22 = vpop.f32.mrb[0].mxu0 }
  0xe7   :  { %v108_v23 = vadd.f32 %v219_v21, %v107_v22  ;;  %v256_v24 = vpop.f32.mrb[1].mxu0 }
  0xe9   :  { %v111_v25 = vmax.f32 %v108_v23, 0.0 }
  0xeb   :  { %266 = vmatmul.mubr.msk.f32.vlgmr.msra.gmra.mrb[0].mxu1 %vm123_vm2, %v111_v25 }
 0x1be   :  { %v193_v27 = vpop.f32.mrb[0].mxu1 }
 0x1bf   :  { %v194_v28 = vadd.f32 %v221_v26, %v193_v27  ;;  %v267_v29 = vpop.f32.mrb[1].mxu1 }
 0x1c1   :  { %v223_v30 = vmul.f32 -1.442695, %v194_v28 }
 0x1c3   :  { %290 = vpow2.f32 %v223_v30 }
 0x1cd   :  { %v291_v31 = vpop.eup %290 }
 0x1ce   :  { %v200_v32 = vadd.f32 1.0, %v291_v31 }
 0x1d0   :  { %292 = vrcp.f32 %v200_v32 }
 0x1da   :  { %v293_v33 = vpop.eup %292 }
 0x1db   :  { %204 = vst.msk [vmem:[#allocation2] sm:$0xff] %vm203_vm3, %v293_v33 }
 0x1dc   :  { %305 = shalt.err (!%p302_p4)
}
 0x1dd   :  { %s306_s23 = scalar_lea.hbm %s414_s5, 128 }
 0x1de   :  { %p307_p5 = scmp.ne.s32.totalorder %s414_s5, %s306_s23  ;;  %p310_p6 = scmp.lt.u32.totalorder %s306_s23, %s414_s5 }
 0x1e0   :  { %p312_p7 = pnand %p310_p6, %p307_p5 }
 0x1e2   :  { %315 = shalt.err (!%p312_p7)
}
 0x1e3   :  { %214 = dma.vmem_to_hbm [thread:$0]  %s212_s2, 128, %s414_s5, [#allocation3]  }
 0x1e4   :  { %316 = dma.done.wait [#allocation3], 128  }
 0x1e5   :  { %317 = vsyncadd [#allocation3], 4294967168 }
 0x1e6   :  { %218 = vsyncpa [#allocation3], 1 }

</bundles_post_ra>
